<compile_context>
chip_gen: v7x
topology: tpu7x:2x2x1
jax: 0.10.0
libtpu: 0.0.40
codegen_flags: <defaults>
</compile_context>

<pallas_src>
import functools

import jax
import jax.numpy as jnp
import numpy as np
from jax import lax
from jax.experimental import pallas as pl
from jax.experimental.pallas import tpu as pltpu


def _round_up(v, m):
    return ((v + m - 1) // m) * m


def _default_tile_rows(c):
    # keep each (tile, C) f32 temporary around ~1 MiB; clamp to [8, 512] rows
    budget = 1 << 20
    t = budget // max(1, 4 * c)
    return max(8, min(512, (t // 8) * 8))


def _ce_topk_kernel(x_ref, y_ref, out_ref, *, k, n_valid):
    i = pl.program_id(0)
    t_rows, n_cls = x_ref.shape

    x = x_ref[...].astype(jnp.float32)            # (T, C): upcast in-kernel
    y = y_ref[...]                                # (T, 1) int32

    # Column iota built once, reused for target mask + first-occurrence masking.
    col = lax.broadcasted_iota(jnp.int32, (t_rows, n_cls), 1)
    y_mask = col == y                             # (T, C)

    # s_y[i] = x[i, y[i]]: a single-nonzero-term sum -> exact on the XLU.
    s_y = jnp.sum(jnp.where(y_mask, x, 0.0), axis=-1, keepdims=True)   # (T, 1)
    a = x - s_y
    e = jnp.exp(a)                                # EUP

    # Big lane reduction (sum of C exp terms) offloaded to the idle MXU.
    # Mosaic's f32 matmul is multi-pass accurate, so this matches jnp.sum
    # to f32 precision.
    ones_c = jnp.ones((n_cls, 1), jnp.float32)
    sum_all = jnp.dot(e, ones_c, preferred_element_type=jnp.float32)   # (T, 1)

    # Subtract exp() of the top-(k-1) NON-target entries (the target itself is
    # always pushed into the excluded set by the scatter-of-global-max; its
    # exp(0)=1 term left inside sum_all is exactly the "+1" of the loss).
    cur = jnp.where(y_mask, -jnp.inf, a)
    top_sub = jnp.zeros((t_rows, 1), jnp.float32)
    for _ in range(k - 1):
        m = jnp.max(cur, axis=-1, keepdims=True)                       # (T, 1)
        top_sub = top_sub + jnp.exp(m)
        # mask exactly one (the first) occurrence of the current max so
        # duplicated values are counted with the right multiplicity
        first = jnp.min(jnp.where(cur == m, col, n_cls), axis=-1, keepdims=True)
        cur = jnp.where(col == first, -jnp.inf, cur)

    denom = sum_all - top_sub                     # >= 1 (target term never removed)

    # mask rows that are padding (N not a multiple of the row tile)
    row = i * t_rows + lax.broadcasted_iota(jnp.int32, (t_rows, 1), 0)
    loss_rows = jnp.where(row < n_valid, jnp.log(denom), 0.0)

    @pl.when(i == 0)
    def _init():
        out_ref[0, 0] = 0.0

    out_ref[0, 0] += jnp.sum(loss_rows)

    @pl.when(i == pl.num_programs(0) - 1)
    def _finalize():
        out_ref[0, 0] = out_ref[0, 0] * (1.0 / n_valid)


def ce_topk_loss(x, y, k, *, tile_rows=None):
    """Pallas TPU implementation of CETopKLoss(k).forward(x, y)."""
    n, c = x.shape
    if not (1 <= k <= c):
        raise ValueError(f"k={k} must satisfy 1 <= k <= num_classes={c}")
    y2 = y.reshape(n, 1).astype(jnp.int32)

    if tile_rows is None:
        tile_rows = _default_tile_rows(c)
    tile_rows = int(max(8, min(_round_up(tile_rows, 8), _round_up(n, 8))))
    n_pad = _round_up(n, tile_rows)
    if n_pad != n:
        x = jnp.pad(x, ((0, n_pad - n), (0, 0)))      # native dtype, no astype
        y2 = jnp.pad(y2, ((0, n_pad - n), (0, 0)))

    grid = (n_pad // tile_rows,)
    kernel = functools.partial(_ce_topk_kernel, k=k, n_valid=n)
    # TODO(synk): for vocab-sized C, add a C-tiled stage with running
    # top-(k-1)/sum-exp scratch and per-tile partial outputs on a "parallel"
    # row axis so v7x's second TensorCore is used.
    out = pl.pallas_call(
        kernel,
        out_shape=jax.ShapeDtypeStruct((1, 1), jnp.float32),
        grid=grid,
        in_specs=[
            pl.BlockSpec((tile_rows, c), lambda i: (i, 0)),
            pl.BlockSpec((tile_rows, 1), lambda i: (i, 0)),
        ],
        out_specs=pl.BlockSpec(memory_space=pltpu.MemorySpace.SMEM),
        compiler_params=pltpu.CompilerParams(
            dimension_semantics=("arbitrary",),        # scalar-accumulation axis
            vmem_limit_bytes=32 * 1024 * 1024,
        ),
    )(x, y2)
    return out[0, 0]


# --- pure-JAX reference mirroring the PyTorch code (gather/scatter/sort) ---
def ce_topk_loss_ref(x, y, k):
    n, c = x.shape
    x = x.astype(jnp.float32)
    s_y = jnp.take_along_axis(x, y.reshape(-1, 1).astype(jnp.int32), axis=-1)
    a = x - s_y
    z = x.at[jnp.arange(n), y].set(jnp.max(x))
    sorted_idx = jnp.argsort(z, axis=-1)               # ascending, like torch.sort
    bottom_idx = sorted_idx[:, : c - k]
    s_bottom = jnp.take_along_axis(a, bottom_idx, axis=-1)
    return jnp.mean(jnp.log(jnp.sum(jnp.exp(s_bottom), axis=-1) + 1.0))


if __name__ == "__main__":
    key = jax.random.PRNGKey(0)
    kx1, ky1, kx2, ky2 = jax.random.split(key, 4)

    # config 1: N=20 rows, C=16 classes
    x1 = jax.random.normal(kx1, (20, 16), dtype=jnp.float32)
    y1 = jax.random.randint(ky1, (20,), 0, 16, dtype=jnp.int32)
    # config 2: N=13 rows (forces row padding), C=40 classes
    x2 = jax.random.normal(kx2, (13, 40), dtype=jnp.float32)
    y2 = jax.random.randint(ky2, (13,), 0, 40, dtype=jnp.int32)

    cases = [
        (x1, y1, 2, None),   # single tile, default tiling
        (x1, y1, 3, 8),      # 3 grid steps, 4 padded rows
        (x1, y1, 7, 8),
        (x2, y2, 5, 8),      # 2 grid steps, 3 padded rows
    ]
    for x, y, k, tile in cases:
        out = jax.block_until_ready(ce_topk_loss(x, y, k, tile_rows=tile))
        ref = jax.block_until_ready(ce_topk_loss_ref(x, y, k))
        np.testing.assert_allclose(np.asarray(out), np.asarray(ref),
                                   rtol=1e-5, atol=1e-5)
    print("KERNEL_OK")
</pallas_src>

<mosaic_0001>
module attributes {stable_mosaic.version = 11 : i64} {
  func.func @_ce_topk_kernel(%arg0: i32, %arg1: memref<24x16xf32, #tpu.memory_space<vmem>>, %arg2: memref<24x1xi32, #tpu.memory_space<vmem>>, %arg3: memref<1x1xf32, #tpu.memory_space<smem>>) attributes {dimension_semantics = [#tpu.dimension_semantics<arbitrary>], iteration_bounds = array<i64: 1>, scalar_prefetch = 0 : i64, scratch_operands = 0 : i64, tpu.core_type = #tpu.core_type<tc>, window_params = [{transform_indices = @transform_0, window_bounds = array<i64: 24, 16>}, {transform_indices = @transform_1, window_bounds = array<i64: 24, 1>}, {transform_indices = @transform_2, window_bounds = array<i64: 1, 1>}]} {
    %c0 = arith.constant 0 : index
    %c0_0 = arith.constant 0 : index
    %0 = vector.load %arg1[%c0, %c0_0] : memref<24x16xf32, #tpu.memory_space<vmem>>, vector<24x16xf32>
    %c0_1 = arith.constant 0 : index
    %c0_2 = arith.constant 0 : index
    %1 = vector.load %arg2[%c0_1, %c0_2] : memref<24x1xi32, #tpu.memory_space<vmem>>, vector<24x1xi32>
    %2 = tpu.iota {dimensions = array<i32: 1>} : vector<24x16xi32>
    %3 = vector.broadcast %1 : vector<24x1xi32> to vector<24x16xi32>
    %4 = arith.cmpi eq, %2, %3 : vector<24x16xi32>
    %cst = arith.constant 0.000000e+00 : f32
    %5 = vector.broadcast %cst : f32 to vector<24x16xf32>
    %6 = arith.select %4, %0, %5 : vector<24x16xi1>, vector<24x16xf32>
    %cst_3 = arith.constant dense<0.000000e+00> : vector<24xf32>
    %7 = vector.multi_reduction <add>, %6, %cst_3 [1] : vector<24x16xf32> to vector<24xf32>
    %8 = vector.shape_cast %7 : vector<24xf32> to vector<24x1xf32>
    %9 = vector.broadcast %8 : vector<24x1xf32> to vector<24x16xf32>
    %10 = arith.subf %0, %9 : vector<24x16xf32>
    %11 = math.exp %10 : vector<24x16xf32>
    %cst_4 = arith.constant 1.000000e+00 : f32
    %12 = vector.broadcast %cst_4 : f32 to vector<16x1xf32>
    %cst_5 = arith.constant dense<0.000000e+00> : vector<24x1xf32>
    %13 = tpu.matmul %11, %12, %cst_5 {dimension_numbers = #tpu.dot_dimension_numbers<[1], [0], [0], [1], [0, 0, 1, 1], [], []>} : vector<24x16xf32>, vector<16x1xf32>, vector<24x1xf32> -> vector<24x1xf32>
    %cst_6 = arith.constant 0xFF800000 : f32
    %14 = vector.broadcast %cst_6 : f32 to vector<24x16xf32>
    %15 = arith.select %4, %14, %10 : vector<24x16xi1>, vector<24x16xf32>
    %cst_7 = arith.constant 0.000000e+00 : f32
    %16 = vector.broadcast %cst_7 : f32 to vector<24x1xf32>
    %cst_8 = arith.constant dense<0xFF800000> : vector<24xf32>
    %17 = vector.multi_reduction <maximumf>, %15, %cst_8 [1] : vector<24x16xf32> to vector<24xf32>
    %18 = vector.shape_cast %17 : vector<24xf32> to vector<24x1xf32>
    %19 = math.exp %18 : vector<24x1xf32>
    %20 = arith.addf %16, %19 : vector<24x1xf32>
    %21 = arith.subf %13, %20 : vector<24x1xf32>
    %c24_i32 = arith.constant 24 : i32
    %22 = arith.muli %arg0, %c24_i32 : i32
    %23 = tpu.iota {dimensions = array<i32: 0>} : vector<24x1xi32>
    %24 = vector.broadcast %22 : i32 to vector<24x1xi32>
    %25 = arith.addi %24, %23 : vector<24x1xi32>
    %c20_i32 = arith.constant 20 : i32
    %26 = vector.broadcast %c20_i32 : i32 to vector<24x1xi32>
    %27 = arith.cmpi slt, %25, %26 : vector<24x1xi32>
    %28 = math.log %21 : vector<24x1xf32>
    %cst_9 = arith.constant 0.000000e+00 : f32
    %29 = vector.broadcast %cst_9 : f32 to vector<24x1xf32>
    %30 = arith.select %27, %28, %29 : vector<24x1xi1>, vector<24x1xf32>
    %c0_i32 = arith.constant 0 : i32
    %31 = arith.cmpi eq, %arg0, %c0_i32 : i32
    %32 = arith.extui %31 : i1 to i32
    %c0_i32_10 = arith.constant 0 : i32
    %33 = arith.cmpi ne, %32, %c0_i32_10 : i32
    scf.if %33 {
      %cst_18 = arith.constant 0.000000e+00 : f32
      %c0_19 = arith.constant 0 : index
      %c0_20 = arith.constant 0 : index
      %44 = memref.load %arg3[%c0_19, %c0_20] : memref<1x1xf32, #tpu.memory_space<smem>>
      memref.store %cst_18, %arg3[%c0_19, %c0_20] : memref<1x1xf32, #tpu.memory_space<smem>>
    } else {
    }
    %c0_11 = arith.constant 0 : index
    %c0_12 = arith.constant 0 : index
    %34 = memref.load %arg3[%c0_11, %c0_12] : memref<1x1xf32, #tpu.memory_space<smem>>
    %35 = vector.shape_cast %30 : vector<24x1xf32> to vector<1x24x1xf32>
    %cst_13 = arith.constant dense<0.000000e+00> : vector<1xf32>
    %36 = vector.multi_reduction <add>, %35, %cst_13 [1, 2] : vector<1x24x1xf32> to vector<1xf32>
    %37 = vector.shape_cast %36 : vector<1xf32> to vector<1x1x1xf32>
    %38 = vector.extract %37[0, 0, 0] : f32 from vector<1x1x1xf32>
    %39 = arith.addf %34, %38 : f32
    %c0_14 = arith.constant 0 : index
    %c0_15 = arith.constant 0 : index
    %40 = memref.load %arg3[%c0_14, %c0_15] : memref<1x1xf32, #tpu.memory_space<smem>>
    memref.store %39, %arg3[%c0_14, %c0_15] : memref<1x1xf32, #tpu.memory_space<smem>>
    %c0_i32_16 = arith.constant 0 : i32
    %41 = arith.cmpi eq, %arg0, %c0_i32_16 : i32
    %42 = arith.extui %41 : i1 to i32
    %c0_i32_17 = arith.constant 0 : i32
    %43 = arith.cmpi ne, %42, %c0_i32_17 : i32
    scf.if %43 {
      %c0_18 = arith.constant 0 : index
      %c0_19 = arith.constant 0 : index
      %44 = memref.load %arg3[%c0_18, %c0_19] : memref<1x1xf32, #tpu.memory_space<smem>>
      %cst_20 = arith.constant 5.000000e-02 : f32
      %45 = arith.mulf %44, %cst_20 : f32
      %c0_21 = arith.constant 0 : index
      %c0_22 = arith.constant 0 : index
      %46 = memref.load %arg3[%c0_21, %c0_22] : memref<1x1xf32, #tpu.memory_space<smem>>
      memref.store %45, %arg3[%c0_21, %c0_22] : memref<1x1xf32, #tpu.memory_space<smem>>
    } else {
    }
    return
  }
  func.func @transform_0(%arg0: i32) -> (i32, i32) {
    %c0_i32 = arith.constant 0 : i32
    %c0_i32_0 = arith.constant 0 : i32
    return %arg0, %c0_i32 : i32, i32
  }
  func.func @transform_1(%arg0: i32) -> (i32, i32) {
    %c0_i32 = arith.constant 0 : i32
    %c0_i32_0 = arith.constant 0 : i32
    return %arg0, %c0_i32 : i32, i32
  }
  func.func @transform_2(%arg0: i32) -> (i32, i32) {
    %c0_i32 = arith.constant 0 : i32
    %c0_i32_0 = arith.constant 0 : i32
    %c0_i32_1 = arith.constant 0 : i32
    return %c0_i32, %c0_i32_0 : i32, i32
  }
}

</mosaic_0001>

<bundles_post_ra>
// kernel: tpu_custom_call.1
= control target key start
LH: loop header
LB: loop body
LE: loop exit
PB: predicated region body
PF: predicated region fallthrough
CT: control target
= control target key end

     0   :  { %v298_v2 = vmov 0   ;;  %s369_s0 = inlined_call_operand.vmem [shape: f32[24,16], index: 0, kind: input, shape index: {}]   ;;  %s370_s1 = inlined_call_operand.vmem [shape: s32[24,1], index: 1, kind: input, shape index: {}]   ;;  %s371_s2 = inlined_call_operand.hbm [shape: f32[1,1], index: 2, kind: output, shape index: {}]  }
   0x1   :  { %v16_v0 = vld [vmem:[%s370_s1 + $0x8] sm:$0xff]  ;;  %v17_v1 = vld [vmem:[%s370_s1 + $0x10] sm:$0xff]  ;;  %266 = vset.pattern.permute.xlu0 %v298_v2  ;;  %267 = vset.pattern.permute.xlu1 %v298_v2 }
   0x2   :  { %7 = vsyncpa [#allocation3], 0  ;;  %24 = vperm.xlu0 %266, %v16_v0   ;;  %27 = vperm.xlu1 %267, %v17_v1   ;;  %v15_v3 = vld [vmem:[%s370_s1] sm:$0xff]  ;;  %v18_v4 = vlaneseq  ;;  %v13_v6 = vld [vmem:[%s369_s0 + $0x8] sm:$0xff]  ;;  %vm35_vm0 = vcmask 130048   ;;  %v299_v18 = vmov 0.0|0.0  }
   0x3   :  { %v12_v11 = vld [vmem:[%s369_s0] sm:$0xff]  ;;  %v14_v12 = vld [vmem:[%s369_s0 + $0x10] sm:$0xff]  ;;  %255 = vmatprep.subr.bf16.mxu1 %v299_v18  ;;  %253 = vmatprep.subr.bf16.mxu0 %v299_v18  ;;  %v300_v19 = vmov 1.0|1.0   ;;  %vm301_vm4 = vmmov 0   ;;  %v302_v20 = vmov 0.0  }
   0x4   :  { %v19_v5 = vand.u32 127, %v18_v4  ;;  %256 = vmatpush3.bf16.msra.mxu1 %v300_v19  ;;  %254 = vmatpush3.bf16.msra.mxu0 %v300_v19  ;;  %v169_v58 = vshrl.u32 %v18_v4, 7  ;;  %vm195_vm5 = vcmask 7168   ;;  %s286_s23 = scalar_lea.hbm %s371_s2, 16 }
   0x5   :  { %247 = vmatprep.mubr.msk.f32.mxu1 %vm301_vm4, %v302_v20  ;;  %244 = vmatprep.mubr.msk.f32.mxu0 %vm301_vm4, %v302_v20  ;;  %p287_p0 = scmp.ne.s32.totalorder %s371_s2, %s286_s23  ;;  %p290_p1 = scmp.lt.u32.totalorder %s286_s23, %s371_s2 }
   0x6   :  { %21 = vperm.xlu0 %266, %v15_v3   ;;  %v171_v61 = vadd.s32 16, %v169_v58 }
   0x7   :  { %p292_p2 = pnand %p290_p1, %p287_p0 }
   0x8   :  { %vm178_vm6 = vcmp.lt.s32.totalorder %v171_v61, 20 }
  0x81   :  { %v25_v7 = vpop.permute.xlu0 %24  ;;  %v28_v8 = vpop.permute.xlu1 %27 }
  0x82   :  { %vm30_vm1 = vcmp.eq.s32.totalorder %v19_v5, %v25_v7  ;;  %vm31_vm2 = vcmp.eq.s32.totalorder %v19_v5, %v28_v8 }
  0x83   :  { %v33_v9 = vsel %vm30_vm1, %v13_v6, 0.0  ;;  %v34_v15 = vsel %vm31_vm2, %v14_v12, 0.0 }
  0x84   :  { %v39_v10 = vsel %vm35_vm0, %v33_v9, 0.0  ;;  %v42_v17 = vsel %vm35_vm0, %v34_v15, 0.0 }
  0x85   :  { %v22_v13 = vpop.permute.xlu0 %21  ;;  %40 = vadd.xlane.f32.xlu1 %v39_v10 }
  0x86   :  { %vm29_vm3 = vcmp.eq.s32.totalorder %v19_v5, %v22_v13 }
  0x87   :  { %v32_v14 = vsel %vm29_vm3, %v12_v11, 0.0 }
  0x88   :  { %v36_v16 = vsel %vm35_vm0, %v32_v14, 0.0 }
  0x89   :  { %37 = vadd.xlane.f32.xlu0 %v36_v16 }
  0x8d   :  { %43 = vadd.xlane.f32.xlu0 %v42_v17 }
 0x112   :  { %v41_v21 = vpop.xlane.xlu1 %40 }
 0x113   :  { %v46_v22 = vsub.f32 %v13_v6, %v41_v21 }
 0x115   :  { %v50_v23 = vmul.f32 1.442695, %v46_v22  ;;  %v144_v24 = vsel %vm30_vm1, -inf, %v46_v22 }
 0x116   :  { %v38_v25 = vpop.xlane.xlu0 %37  ;;  %v149_v26 = vsel %vm35_vm0, %v144_v24, -inf }
 0x117   :  { %268 = vpow2.f32 %v50_v23  ;;  %v45_v27 = vsub.f32 %v12_v11, %v38_v25  ;;  %150 = vmax.xlane.f32.xlu0 %v149_v26 }
 0x119   :  { %v48_v28 = vmul.f32 1.442695, %v45_v27  ;;  %v143_v29 = vsel %vm29_vm3, -inf, %v45_v27 }
 0x11a   :  { %v44_v30 = vpop.xlane.xlu0 %43  ;;  %v146_v31 = vsel %vm35_vm0, %v143_v29, -inf }
 0x11b   :  { %270 = vpow2.f32 %v48_v28  ;;  %v47_v32 = vsub.f32 %v14_v12, %v44_v30  ;;  %147 = vmax.xlane.f32.xlu1 %v146_v31 }
 0x11d   :  { %v52_v33 = vmul.f32 1.442695, %v47_v32  ;;  %v145_v34 = vsel %vm31_vm2, -inf, %v47_v32 }
 0x11e   :  { %v152_v35 = vsel %vm35_vm0, %v145_v34, -inf }
 0x11f   :  { %272 = vpow2.f32 %v52_v33  ;;  %153 = vmax.xlane.f32.xlu1 %v152_v35 }
 0x121   :  { %v269_v36 = vpop.eup %268 }
 0x122   :  { %248 = vmatmul.mubr.msk.f32.vlgmr.msra.gmra.mrb[0].mxu1 %vm35_vm0, %v269_v36 }
 0x123   :  { %250 = vmatprep.mubr.msk.f32.mxu1 %vm301_vm4, %v302_v20 }
 0x125   :  { %v271_v37 = vpop.eup %270 }
 0x126   :  { %245 = vmatmul.mubr.msk.f32.vlgmr.msra.gmra.mrb[0].mxu0 %vm35_vm0, %v271_v37 }
 0x129   :  { %v273_v38 = vpop.eup %272 }
 0x12a   :  { %251 = vmatmul.mubr.msk.f32.gmra.mrb[2].mxu1 %vm35_vm0, %v273_v38 }
 0x1a4   :  { %v151_v39 = vpop.xlane.xlu0 %150 }
 0x1a5   :  { %v157_v41 = vmul.f32 1.442695, %v151_v39 }
 0x1a7   :  { %274 = vpow2.f32 %v157_v41 }
 0x1a8   :  { %v148_v40 = vpop.xlane.xlu1 %147 }
 0x1a9   :  { %v155_v42 = vmul.f32 1.442695, %v148_v40 }
 0x1ab   :  { %276 = vpow2.f32 %v155_v42 }
 0x1ac   :  { %v154_v43 = vpop.xlane.xlu1 %153 }
 0x1ad   :  { %v159_v44 = vmul.f32 1.442695, %v154_v43 }
 0x1af   :  { %278 = vpow2.f32 %v159_v44 }
 0x1b1   :  { %v275_v45 = vpop.eup %274 }
 0x1b5   :  { %v277_v49 = vpop.eup %276 }
 0x1b9   :  { %v279_v53 = vpop.eup %278 }
 0x1f5   :  { %v134_v46 = vpop.f32.mrb[0].mxu1 }
 0x1f6   :  { %v165_v47 = vsub.f32 %v134_v46, %v275_v45  ;;  %v249_v48 = vpop.f32.mrb[1].mxu1 }
 0x1f8   :  { %280 = vlog2.f32 %v165_v47 }
 0x1f9   :  { %v129_v50 = vpop.f32.mrb[0].mxu0 }
 0x1fa   :  { %v164_v51 = vsub.f32 %v129_v50, %v277_v49  ;;  %v246_v52 = vpop.f32.mrb[1].mxu0 }
 0x1fc   :  { %282 = vlog2.f32 %v164_v51 }
 0x1fd   :  { %v139_v54 = vpop.f32.mrb[2].mxu1 }
 0x1fe   :  { %v166_v55 = vsub.f32 %v139_v54, %v279_v53  ;;  %v252_v56 = vpop.f32.mrb[3].mxu1 }
 0x200   :  { %284 = vlog2.f32 %v166_v55 }
 0x202   :  { %v281_v57 = vpop.eup %280 }
 0x203   :  { %v182_v59 = vmul.f32 0.6931472, %v281_v57 }
 0x205   :  { %v197_v0 = vsel %vm195_vm5, %v182_v59, 0.0 }
 0x206   :  { %v283_v60 = vpop.eup %282 }
 0x207   :  { %v180_v62 = vmul.f32 0.6931472, %v283_v60 }
 0x209   :  { %v196_v63 = vsel %vm195_vm5, %v180_v62, 0.0 }
 0x20a   :  { %v285_v1 = vpop.eup %284  ;;  %v198_v2 = vadd.f32 %v197_v0, %v196_v63 }
 0x20b   :  { %v184_v3 = vmul.f32 0.6931472, %v285_v1 }
 0x20d   :  { %v187_v5 = vsel %vm178_vm6, %v184_v3, 0.0 }
 0x20e   :  { %v199_v6 = vsel %vm195_vm5, %v187_v5, 0.0 }
 0x20f   :  { %v200_v7 = vadd.f32 %v199_v6, %v198_v2 }
 0x211   :  { %201 = vadd.xlane.f32.xlu0 %v200_v7 }
 0x29e   :  { %v202_v8 = vpop.xlane.xlu0 %201 }
 0x29f   :  { %v203_v9 = vrot.slane %v202_v8, 4 }
 0x2a1   :  { %v204_v10 = vadd.f32 %v203_v9, %v202_v8 }
 0x2a3   :  { %v205_v11 = vrot.slane %v204_v10, 2 }
 0x2a5   :  { %v206_v4 = vadd.f32 %v205_v11, %v204_v10 }
 0x2a7   :  { %v207_v12 = vrot.slane %v206_v4, 1 }
 0x2a9   :  { %v208_v13 = vadd.f32 %v207_v12, %v206_v4 }
 0x2ab   :  { %257 = vpush %v208_v13 }
 0x2dc   :  { %s258_s0 = spop %257 }
 0x2dd   :  { %s217_s20 = smul.f32 0.05, %s258_s0 }
 0x2df   :  { %218 = sst [smem:[#allocation2]] %s217_s20 }
 0x2e0   :  { %295 = shalt.err (!%p292_p2)
}
 0x2e1   :  { %s303_s28 = smov [#allocation2]  }
 0x2e2   :  { %226 = dma.smem_to_hbm %s303_s28, 16, %s371_s2, [#allocation3]  }
 0x2e3   :  { %296 = dma.done.wait [#allocation3], 16  }
 0x2e4   :  { %297 = vsyncadd [#allocation3], 4294967280 }
 0x2e5   :  { %230 = sfence }
 0x2e6   :  { %231 = vsyncpa [#allocation3], 1 }

</bundles_post_ra>
